<compile_context>
chip_gen: v6e
topology: v6e:2x2x1
jax: 0.10.0
libtpu: 0.0.40
codegen_flags: <defaults>
</compile_context>

<pallas_src>
import functools

import jax
import jax.numpy as jnp
from jax import lax
from jax.experimental import pallas as pl
from jax.experimental.pallas import tpu as pltpu

_LANE = 128
_MIB = 1024 * 1024


# ---------------------------------------------------------------------------
# VMEM budgeting (generation-aware)
# ---------------------------------------------------------------------------
def _tpu_vmem_capacity_bytes():
    try:
        return int(pltpu.get_tpu_info().vmem_capacity_bytes)
    except Exception:
        return 64 * _MIB          # conservative (v7x per-TC physical VMEM)


def _vmem_limit_bytes():
    cap = _tpu_vmem_capacity_bytes()
    # ~40 MiB scoped on 64-MiB chips (v7x), ~96 MiB on 128-MiB chips (v5e/v6e).
    return max(min(int(cap * 0.75), cap - 24 * _MIB), 16 * _MIB)


def _vmem_tile_budget_bytes():
    # Leave ~25% of the scoped limit as compiler/internal headroom.
    return (3 * _vmem_limit_bytes()) // 4


def _pick_k_tile(m, k, dtype_bytes, cast_bf16):
    """Largest K tile (multiple of 128, or == K) that divides K and keeps the
    double-buffered F chunk + double-buffered G output (+ bf16 temp) in budget."""
    budget = _vmem_tile_budget_bytes()
    fixed = 2 * m * m * 4                                   # G output, 2 pipeline bufs
    per_col = m * (2 * dtype_bytes + (2 if cast_bf16 else 0))
    avail = max(budget - fixed, per_col * _LANE)
    tk_max = max(avail // per_col, _LANE)
    tk_max = min(tk_max, k)
    if k <= tk_max:
        return k                                            # whole reduction, one step
    tk = (tk_max // _LANE) * _LANE
    while k % tk != 0:                                      # k is a multiple of 128 here
        tk -= _LANE
    return max(tk, _LANE)


# ---------------------------------------------------------------------------
# Kernel: partial gram accumulated directly into the output block
# ---------------------------------------------------------------------------
def _gram_kernel(f_ref, g_ref, *, inv_norm, cast_bf16):
    kk = pl.program_id(1)

    @pl.when(kk == 0)
    def _():
        g_ref[...] = jnp.zeros_like(g_ref)

    f = f_ref[...]
    if cast_bf16 and f.dtype == jnp.float32:
        f = f.astype(jnp.bfloat16)                           # bf16 MXU feed, f32 accum
    precision = lax.Precision.HIGHEST if f.dtype == jnp.float32 else None
    # F_chunk @ F_chunk.T as a last-axis contraction (no XLU transpose).
    g_ref[...] += lax.dot_general(
        f, f,
        dimension_numbers=(((1,), (1,)), ((), ())),
        preferred_element_type=jnp.float32,
        precision=precision)

    @pl.when(kk == pl.num_programs(1) - 1)
    def _():
        g_ref[...] = g_ref[...] * inv_norm


# ---------------------------------------------------------------------------
# Wrappers
# ---------------------------------------------------------------------------
def gram_matrix(x, *, k_tile=None, num_k_splits=None, use_bf16=True):
    """Pallas equivalent of PyTorch gram_matrix(); x is NCHW."""
    a, b, c, d = x.shape
    m, k = a * b, c * d
    inv_norm = 1.0 / float(a * b * c * d)
    feats = x.reshape(m, k)                                  # keep source dtype

    # Zero-pad K to a lane multiple (zero columns don't change F @ F.T).
    k_pad = (-k) % _LANE
    if k_pad:
        feats = jnp.pad(feats, ((0, 0), (0, k_pad)))
    kp = k + k_pad

    dtype_bytes = jnp.dtype(feats.dtype).itemsize
    cast_bf16 = bool(use_bf16) and feats.dtype == jnp.float32
    tk = k_tile if k_tile is not None else _pick_k_tile(m, kp, dtype_bytes, cast_bf16)
    assert kp % tk == 0, (kp, tk)
    nk = kp // tk

    # Leading 'parallel' axis: lets v7x's 2 TensorCores split the K reduction.
    splits = num_k_splits if num_k_splits is not None else (2 if (nk >= 2 and nk % 2 == 0) else 1)
    if splits < 1 or nk % splits != 0:
        splits = 1
    nk_per_split = nk // splits

    cost = pl.CostEstimate(
        flops=2 * m * m * kp,
        transcendentals=0,
        bytes_accessed=m * kp * dtype_bytes + splits * m * m * 4)

    partial_g = pl.pallas_call(
        functools.partial(_gram_kernel, inv_norm=inv_norm, cast_bf16=cast_bf16),
        out_shape=jax.ShapeDtypeStruct((splits, m, m), jnp.float32),
        grid=(splits, nk_per_split),
        in_specs=[pl.BlockSpec((m, tk), lambda s, kk: (0, s * nk_per_split + kk))],
        out_specs=pl.BlockSpec((None, m, m), lambda s, kk: (s, 0, 0)),
        compiler_params=pltpu.CompilerParams(
            dimension_semantics=("parallel", "arbitrary"),
            vmem_limit_bytes=_vmem_limit_bytes()),
        cost_estimate=cost,
    )(feats)

    # Tiny epilogue: sum per-split partial grams (no-op cost next to the F read).
    return jnp.sum(partial_g, axis=0)


class StyleLoss:
    """JAX/Pallas port of the PyTorch StyleLoss module (forward pass)."""

    def __init__(self, target_feature, *, k_tile=None, num_k_splits=None, use_bf16=True):
        self._k_tile = k_tile
        self._num_k_splits = num_k_splits
        self._use_bf16 = use_bf16
        # Target gram computed once (detached constant) with the same kernel.
        self.target = gram_matrix(target_feature, k_tile=k_tile,
                                  num_k_splits=num_k_splits, use_bf16=use_bf16)

    def __call__(self, x):
        g = gram_matrix(x, k_tile=self._k_tile,
                        num_k_splits=self._num_k_splits, use_bf16=self._use_bf16)
        # MSE on the (M, M) gram is one cheap XLA op outside the kernel.
        loss = jnp.mean((g - self.target) ** 2)
        # Side-effect stash mirrors the PyTorch module (not jit/trace-safe).
        self.G = g
        self.loss = loss
        return x                                              # pass-through forward


# ---------------------------------------------------------------------------
# Pure-JAX references for correctness checking
# ---------------------------------------------------------------------------
def _gram_ref(x):
    a, b, c, d = x.shape
    f = x.reshape(a * b, c * d).astype(jnp.float32)
    g = jnp.dot(f, f.T, precision=lax.Precision.HIGHEST)
    return g / float(a * b * c * d)


def _style_loss_ref(x, target_feature):
    g = _gram_ref(x)
    t = _gram_ref(target_feature)
    return jnp.mean((g - t) ** 2)


# ---------------------------------------------------------------------------
if __name__ == "__main__":
    key = jax.random.PRNGKey(0)
    k1, k2 = jax.random.split(key)

    # (N, C, H, W) -> M = 8, K = 256
    x_shape = (2, 4, 16, 16)
    target_feature = jax.random.normal(k1, x_shape, dtype=jnp.float32)
    x = jax.random.normal(k2, x_shape, dtype=jnp.float32)

    g_ref = _gram_ref(x)
    loss_ref = _style_loss_ref(x, target_feature)

    # --- Path 1: default bf16 MXU feed; k_tile=128 -> 2 K blocks -> K split across
    #     the 2-TC 'parallel' axis (splits=2, one step per split). ---
    module = StyleLoss(target_feature, k_tile=128)
    out = jax.block_until_ready(module(x))
    loss = jax.block_until_ready(module.loss)
    g = jax.block_until_ready(module.G)

    assert out.shape == x.shape and jnp.allclose(out, x), "forward must pass input through"
    # bf16-MXU path: dtype-aware (loose) tolerances.
    assert jnp.allclose(g, g_ref, rtol=2e-2, atol=2e-2), "gram mismatch (bf16 path)"
    assert jnp.allclose(loss, loss_ref, rtol=5e-2, atol=1e-5), "mse loss mismatch (bf16 path)"

    # --- Path 2: full-f32 MXU path, single split -> exercises the multi-step
    #     init/accumulate/finalize reduction on the 'arbitrary' axis. ---
    module32 = StyleLoss(target_feature, k_tile=128, num_k_splits=1, use_bf16=False)
    out32 = jax.block_until_ready(module32(x))
    loss32 = jax.block_until_ready(module32.loss)
    g32 = jax.block_until_ready(module32.G)

    assert jnp.allclose(out32, x), "forward must pass input through"
    assert jnp.allclose(g32, g_ref, rtol=1e-4, atol=1e-5), "gram mismatch (f32 path)"
    assert jnp.allclose(loss32, loss_ref, rtol=1e-3, atol=1e-7), "mse loss mismatch (f32 path)"

    print("KERNEL_OK")
</pallas_src>

<mosaic_0001>
module attributes {stable_mosaic.version = 11 : i64} {
  func.func @_gram_kernel(%arg0: i32, %arg1: i32, %arg2: memref<8x128xf32, #tpu.memory_space<vmem>>, %arg3: memref<1x8x8xf32, #tpu.memory_space<vmem>>) attributes {dimension_semantics = [#tpu.dimension_semantics<parallel>, #tpu.dimension_semantics<arbitrary>], iteration_bounds = array<i64: 2, 1>, scalar_prefetch = 0 : i64, scratch_operands = 0 : i64, tpu.core_type = #tpu.core_type<tc>, window_params = [{transform_indices = @transform_0, window_bounds = array<i64: 8, 128>}, {transform_indices = @transform_1, window_bounds = array<i64: 1, 8, 8>}]} {
    %c0_i32 = arith.constant 0 : i32
    %0 = arith.cmpi eq, %arg1, %c0_i32 : i32
    %1 = arith.extui %0 : i1 to i32
    %c0_i32_0 = arith.constant 0 : i32
    %2 = arith.cmpi ne, %1, %c0_i32_0 : i32
    scf.if %2 {
      %cst_10 = arith.constant 0.000000e+00 : f32
      %15 = vector.broadcast %cst_10 : f32 to vector<8x8xf32>
      %c0_11 = arith.constant 0 : index
      %c0_12 = arith.constant 0 : index
      %c0_13 = arith.constant 0 : index
      %16 = vector.load %arg3[%c0_11, %c0_12, %c0_13] : memref<1x8x8xf32, #tpu.memory_space<vmem>>, vector<1x8x8xf32>
      %17 = vector.shape_cast %16 : vector<1x8x8xf32> to vector<8x8xf32>
      %18 = vector.shape_cast %15 : vector<8x8xf32> to vector<1x8x8xf32>
      tpu.vector_store %arg3[%c0_11, %c0_12, %c0_13], %18 {strides = array<i32>} : memref<1x8x8xf32, #tpu.memory_space<vmem>>, vector<1x8x8xf32>,
    } else {
    }
    %c0 = arith.constant 0 : index
    %c0_1 = arith.constant 0 : index
    %3 = vector.load %arg2[%c0, %c0_1] : memref<8x128xf32, #tpu.memory_space<vmem>>, vector<8x128xf32>
    %4 = arith.truncf %3 : vector<8x128xf32> to vector<8x128xbf16>
    %c0_2 = arith.constant 0 : index
    %c0_3 = arith.constant 0 : index
    %c0_4 = arith.constant 0 : index
    %5 = vector.load %arg3[%c0_2, %c0_3, %c0_4] : memref<1x8x8xf32, #tpu.memory_space<vmem>>, vector<1x8x8xf32>
    %6 = vector.shape_cast %5 : vector<1x8x8xf32> to vector<8x8xf32>
    %cst = arith.constant dense<0.000000e+00> : vector<8x8xf32>
    %7 = tpu.matmul %4, %4, %cst {dimension_numbers = #tpu.dot_dimension_numbers<[1], [1], [0], [0], [0, 0, 1, 0], [], []>} : vector<8x128xbf16>, vector<8x128xbf16>, vector<8x8xf32> -> vector<8x8xf32>
    %8 = arith.addf %6, %7 : vector<8x8xf32>
    %c0_5 = arith.constant 0 : index
    %c0_6 = arith.constant 0 : index
    %c0_7 = arith.constant 0 : index
    %9 = vector.load %arg3[%c0_5, %c0_6, %c0_7] : memref<1x8x8xf32, #tpu.memory_space<vmem>>, vector<1x8x8xf32>
    %10 = vector.shape_cast %9 : vector<1x8x8xf32> to vector<8x8xf32>
    %11 = vector.shape_cast %8 : vector<8x8xf32> to vector<1x8x8xf32>
    tpu.vector_store %arg3[%c0_5, %c0_6, %c0_7], %11 {strides = array<i32>} : memref<1x8x8xf32, #tpu.memory_space<vmem>>, vector<1x8x8xf32>,
    %c0_i32_8 = arith.constant 0 : i32
    %12 = arith.cmpi eq, %arg1, %c0_i32_8 : i32
    %13 = arith.extui %12 : i1 to i32
    %c0_i32_9 = arith.constant 0 : i32
    %14 = arith.cmpi ne, %13, %c0_i32_9 : i32
    scf.if %14 {
      %c0_10 = arith.constant 0 : index
      %c0_11 = arith.constant 0 : index
      %c0_12 = arith.constant 0 : index
      %15 = vector.load %arg3[%c0_10, %c0_11, %c0_12] : memref<1x8x8xf32, #tpu.memory_space<vmem>>, vector<1x8x8xf32>
      %16 = vector.shape_cast %15 : vector<1x8x8xf32> to vector<8x8xf32>
      %cst_13 = arith.constant 4.8828125E-4 : f32
      %17 = vector.broadcast %cst_13 : f32 to vector<8x8xf32>
      %18 = arith.mulf %16, %17 : vector<8x8xf32>
      %c0_14 = arith.constant 0 : index
      %c0_15 = arith.constant 0 : index
      %c0_16 = arith.constant 0 : index
      %19 = vector.load %arg3[%c0_14, %c0_15, %c0_16] : memref<1x8x8xf32, #tpu.memory_space<vmem>>, vector<1x8x8xf32>
      %20 = vector.shape_cast %19 : vector<1x8x8xf32> to vector<8x8xf32>
      %21 = vector.shape_cast %18 : vector<8x8xf32> to vector<1x8x8xf32>
      tpu.vector_store %arg3[%c0_14, %c0_15, %c0_16], %21 {strides = array<i32>} : memref<1x8x8xf32, #tpu.memory_space<vmem>>, vector<1x8x8xf32>,
    } else {
    }
    return
  }
  func.func @transform_0(%arg0: i32, %arg1: i32) -> (i32, i32) {
    %c1_i32 = arith.constant 1 : i32
    %0 = arith.muli %arg0, %c1_i32 : i32
    %1 = arith.addi %0, %arg1 : i32
    %c0_i32 = arith.constant 0 : i32
    %c0_i32_0 = arith.constant 0 : i32
    return %c0_i32, %1 : i32, i32
  }
  func.func @transform_1(%arg0: i32, %arg1: i32) -> (i32, i32, i32) {
    %c0_i32 = arith.constant 0 : i32
    %c0_i32_0 = arith.constant 0 : i32
    %c0_i32_1 = arith.constant 0 : i32
    return %arg0, %c0_i32, %c0_i32_0 : i32, i32, i32
  }
}

</mosaic_0001>

<bundles_post_ra>
// kernel: tpu_custom_call.1
= control target key start
LH: loop header
LB: loop body
LE: loop exit
PB: predicated region body
PF: predicated region fallthrough
CT: control target
= control target key end

     0   :  { %6 = vsyncpa [#allocation3], 0  ;;  %s646_s0 = inlined_call_operand.hbm [shape: f32[8,256], index: 0, kind: input, shape index: {}]   ;;  %s647_s1 = inlined_call_operand.hbm [shape: f32[2,8,8], index: 1, kind: output, shape index: {}]  }
   0x1   :  { %8 = vsyncpa [#allocation3 + $0x1], 0 }
   0x2   :  { %9 = vsyncpa [#allocation4], 0 }
   0x3   :  { %11 = vsyncpa [#allocation4 + $0x1], 0  ;;  %s509_s6 = smov 0   ;;  %s511_s7 = smov 0  }
   0x4   :  { %s513_s8 = smov 0   ;;  %s515_s9 = smov 0  }
   0x5   :  { %s517_s10 = smov 0   ;;  %s519_s11 = smov 0  }
   0x6 LB: > { %s300_s12 = sadd.s32 4294967295, %s493_s11   ;;  %s301_s13 = sadd.s32 4294967294, %s493_s11   ;;  %s493_s11 = sphi %s519_s11, %s17_s11   ;;  %s489_s10 = sphi %s517_s10, %s659_s10   ;;  %s485_s9 = sphi %s515_s9, %s658_s9   ;;  %s481_s8 = sphi %s513_s8, %s657_s8   ;;  %s477_s7 = sphi %s511_s7, %s656_s7   ;;  %s473_s6 = sphi %s509_s6, %s655_s6  }
   0x7   : > { %s29_s14 = sadd.s32 1, %s489_s10  ;;  %s38_s15 = sadd.s32 1, %s481_s8 }
   0x8   : > { %p31_p0 = scmp.ge.s32.totalorder %s29_s14, 2  ;;  %p45_p1 = scmp.ne.s32.totalorder %s481_s8, %s477_s7 }
   0x9   : > { %p46_p2 = scmp.eq.s32.totalorder %s493_s11, 0  ;;  %p51_p3 = scmp.ne.s32.totalorder %s477_s7, %s473_s6 }
   0xa   : > { %s661_s14 = smov (%p31_p0, %s29_s14), 0  ;;  %p52_p5 = scmp.eq.s32.totalorder %s300_s12, 0 }
   0xb   : > { %p550_p4 = por %p46_p2, %p45_p1  ;;  %s35_s17 = ssub.s32 %s489_s10, %s661_s14 }
   0xc   : > { %p75_p6 = scmp.eq.s32.totalorder %s300_s12, 1  ;;  %p36_p7 = scmp.eq.s32.totalorder %s35_s17, 0 }
   0xd   : > { %p556_p8 = por %p52_p5, %p51_p3  ;;  %p81_p10 = scmp.eq.s32.totalorder %s301_s13, 1 }
   0xe   : > { %p560_p9 = por %p75_p6, %p45_p1  ;;  %p333_p13 = scmp.lt.s32.totalorder %s493_s11, 2 }
   0xf   : > { %s565_s20 = scalar_select %p36_p7, %s481_s8, %s38_s15  }
  0x10   : > { %p567_p11 = por %p81_p10, %p51_p3  ;;  %s101_s22 = sand.u32 1, %s481_s8  }
  0x11   : > { %s304_s23 = sshll.u32 %s101_s22, 3  ;;  %s305_s24 = sshll.u32 %s489_s10, 7 }
  0x12   : > { %s651_s21 = scalar_select %p567_p11, 1, 0 }
  0x13   : > { %s111_s27 = scalar_lea.hbm %s646_s0, %s305_s24  ;;  %s105_s28 = scalar_lea.vmem [#allocation2], %s304_s23 }
  0x14   : > { %s113_s29 = sshll.u32 %s105_s28, 4  ;;  %p580_p0 = pnand %p333_p13, %p550_p4  ;;  %s114_s29 = int_to_ptr.vmem [resolvable:$true] %s113_s29 }
  0x15   : > { %p306_p1 = scmp.ge.s32.totalorder %s493_s11, 1  ;;  %p118_p2 = scmp.lt.s32.totalorder %s493_s11, 3 }
  0x16   : > { %s102_s2 = scalar_lea.sflag [#allocation3], %s101_s22  ;;  %p387_p3 = pneg %p580_p0 }
  0x17   : > { %s398_s3 = scalar_lea.vmem %s114_s29, 128  ;;  %s495_s4 = smov [#allocation2]  }
  0x18   : > { %p399_p5 = scmp.ne.s32.totalorder %s114_s29, %s398_s3  ;;  %s403_s5 = sshll.u32 %s495_s4, 4  ;;  %s404_s5 = int_to_ptr.vmem [resolvable:$false] %s403_s5 }
  0x19   : > { %s405_s12 = scalar_lea.vmem %s404_s5, 256  ;;  %p406_p10 = scmp.lt.s32.totalorder %s114_s29, %s404_s5 }
  0x1a   : > { %p401_p6 = pnand %p399_p5, %p387_p3  ;;  %p407_p12 = scmp.lt.s32.totalorder %s405_s12, %s398_s3 }
  0x1c   : > { %p402_p7 = pneg %p401_p6  ;;  %p408_p4 = por %p407_p12, %p406_p10 }
  0x1e   : > { %p409_p13 = pnand %p408_p4, %p402_p7 }
  0x20   : > { %412 = shalt.err (!%p409_p13)
}
  0x21   : > { %328 = dma.hbm_to_vmem [thread:$0]  (!%p580_p0), %s111_s27, 128, %s114_s29, %s102_s2  }
  0x22   : > { %p119_p11 = pnand %p306_p1, %p118_p2 }
  0x23   : > { %s595_s13 = sand.u32 (!%p119_p11), 1, %s477_s7  }
  0x24   : > { %122 = sbr.rel (%p119_p11) target bundleno = 270 (0x10e), region = 24  ;;  %s307_s15 = sshll.u32 (!%p119_p11), %s595_s13, 3 }
  0x25   : > { %s125_s16 = scalar_lea.sflag (!%p119_p11), [#allocation3], %s595_s13  ;;  %s128_s17 = scalar_lea.vmem (!%p119_p11), [#allocation2], %s307_s15 }
  0x29   : > { %464 = dma.done.wait (%p556_p8), %s125_s16, 128  }
  0x2a   : > { %466 = vsyncadd (%p556_p8), %s125_s16, 4294967168  ;;  %vm153_vm0 = vcmask 64512   ;;  %s146_s22 = scalar_lea.vmem [#allocation5], %s307_s15  ;;  %v496_v0 = vmov 0.0   ;;  %vm497_vm1 = vmmov 0   ;;  %v155_v1 = vld [vmem:[%s128_s17] sm:$0xff] }
  0x2b   : > { %154 = vst.msk [vmem:[%s146_s22] sm:$0xff] %vm153_vm0, %v496_v0  ;;  %315 = vmatprep.subr.bf16.mxu0 %v496_v0  ;;  %317 = vmatprep.mubr.msk.bf16.mxu0 %vm497_vm1, %v496_v0  ;;  %v156_v2 = vpack.c.bf16 %v155_v1, %v155_v1  ;;  %s310_s18 = sshll.u32 %s485_s9, 7  ;;  %s221_s23 = sshll.u32 %s146_s22, 4  ;;  %s222_s23 = int_to_ptr.vmem [resolvable:$true] %s221_s23 }
  0x2c   : > { %s219_s26 = scalar_lea.hbm %s647_s1, %s310_s18  ;;  %s208_s27 = scalar_lea.sflag [#allocation4], %s595_s13 }
  0x2d   : > { %316 = vmatpush3.bf16.xpose.msra.mxu0 %v156_v2  ;;  %s413_s28 = scalar_lea.vmem %s222_s23, 128  ;;  %s498_s29 = smov [#allocation5]  }
  0x2e   : > { %p414_p8 = scmp.ne.s32.totalorder %s222_s23, %s413_s28  ;;  %s417_s30 = sshll.u32 %s498_s29, 4  ;;  %s418_s30 = int_to_ptr.vmem [resolvable:$false] %s417_s30 }
  0x2f   : > { %s419_s9 = scalar_lea.vmem %s418_s30, 256  ;;  %p420_p0 = scmp.lt.s32.totalorder %s222_s23, %s418_s30 }
  0x30   : > { %p415_p11 = pnand %p414_p8, %p560_p9  ;;  %p421_p1 = scmp.lt.s32.totalorder %s419_s9, %s413_s28 }
  0x32   : > { %v157_v3 = vld [vmem:[%s146_s22] sm:$0xff]  ;;  %p416_p12 = pneg %p415_p11  ;;  %p422_p2 = por %p421_p1, %p420_p0 }
  0x34   : > { %318 = vmatmul.mubr.bf16.vlgmr.msra.gmra.mxu0 %v156_v2  ;;  %p423_p3 = pnand %p422_p2, %p416_p12 }
  0xf4   : > { %v192_v4 = vpop.f32.mrf.mxu0 }
  0xf5   : > { %v198_v5 = vadd.f32 %v192_v4, %v157_v3 }
  0xf6   : > { %v319_v6 = vpop.f32.mrf.mxu0 }
  0xf7   : > { %200 = vst.msk [vmem:[%s146_s22] sm:$0xff] %vm153_vm0, %v198_v5 }
  0xf8   : > { %v195_v7 = vpop.f32.mrf.mxu0 }
  0xfa   : > { %v320_v8 = vpop.f32.mrf.mxu0 }
  0xfe   : > { %v204_v9 = vld [vmem:[%s146_s22] sm:$0xff] }
  0xff   : > { %v205_v10 = vmul.f32 0.00048828125, %v204_v9 }
 0x101   : > { %206 = vst.msk [vmem:[%s146_s22] sm:$0xff] %vm153_vm0, %v205_v10 }
 0x102   : > { %426 = shalt.err (!%p423_p3)
}
 0x103   : > { %s427_s2 = scalar_lea.hbm %s219_s26, 128  ;;  %s431_s5 = scalar_lea.hbm %s647_s1, 256 }
 0x104   : > { %p428_p5 = scmp.ne.s32.totalorder %s219_s26, %s427_s2  ;;  %p432_p10 = scmp.lt.s32.totalorder %s219_s26, %s647_s1 }
 0x105   : > { %p433_p4 = scmp.lt.s32.totalorder %s431_s5, %s427_s2 }
 0x106   : > { %p429_p6 = pnand %p428_p5, %p560_p9 }
 0x107   : > { %p434_p13 = por %p433_p4, %p432_p10 }
 0x108   : > { %p430_p7 = pneg %p429_p6 }
 0x10a   : > { %p435_p8 = pnand %p434_p13, %p430_p7 }
 0x10c   : > { %438 = shalt.err (!%p435_p8)
}
 0x10d   : > { %323 = dma.vmem_to_hbm [thread:$0]  (%p560_p9), %s222_s23, 128, %s219_s26, %s208_s27  }
 0x10e PF: > { %s233_s15 = sand.u32 1, %s473_s6   ;;  %p653_p11 = scmp.ne.s32.totalorder %s651_s21, 0 }
 0x10f   : > { %p654_p12 = scmp.ge.s32.totalorder %s493_s11, 2  ;;  %s234_s16 = scalar_lea.sflag [#allocation4], %s233_s15 }
 0x111   : > { %p330_p0 = pnand %p654_p12, %p653_p11 }
 0x113   : > { %p331_p1 = pneg %p330_p0 }
 0x115   : > { %468 = dma.done.wait (%p331_p1), %s234_s16, 128  }
 0x116   : > { %470 = vsyncadd (%p331_p1), %s234_s16, 4294967168  ;;  %s17_s11 = sadd.s32 1, %s493_s11   ;;  %s655_s6 = smov %s477_s7 }
 0x117   : > { %p14_p2 = scmp.ge.s32.totalorder %s17_s11, 4   ;;  %s656_s7 = smov %s481_s8 }
 0x118   : > { %s657_s8 = smov %s565_s20  ;;  %s658_s9 = smov %s489_s10 }
 0x119   : > { %s659_s10 = smov %s661_s14  ;;  %16 = sbr.rel (!%p14_p2) target bundleno = 6 (0x6), region = 77 }
 0x11e   :  { %239 = vsyncpa [#allocation3], 1 }
 0x11f   :  { %241 = vsyncpa [#allocation3 + $0x1], 1 }
 0x120   :  { %242 = vsyncpa [#allocation4], 1 }
 0x121   :  { %244 = vsyncpa [#allocation4 + $0x1], 1 }

</bundles_post_ra>
